<compile_context>
chip_gen: v6e
topology: v6e:2x2x1
jax: 0.10.0
libtpu: 0.0.40
codegen_flags: <defaults>
</compile_context>

<pallas_src>
import functools

import jax
import jax.numpy as jnp
from jax import lax
from jax.experimental import pallas as pl
from jax.experimental.pallas import tpu as pltpu


# --------------------------------------------------------------------------- #
# Kernel
# --------------------------------------------------------------------------- #
def bert_layer_norm_kernel(x_ref, gamma_ref, beta_ref, o_ref, *, eps, inv_h):
    # x_ref / o_ref: (tm, H) row tile; gamma_ref / beta_ref: (1, H).
    x = x_ref[...].astype(jnp.float32)
    u = jnp.sum(x, axis=-1, keepdims=True) * inv_h          # row mean
    xc = x - u
    s = jnp.sum(xc * xc, axis=-1, keepdims=True) * inv_h    # centered variance
    inv = lax.rsqrt(s + eps)                                 # EUP; eps inside sqrt
    scale = gamma_ref[...].astype(jnp.float32) * inv         # fold gamma into 1/std
    beta = beta_ref[...].astype(jnp.float32)
    o_ref[...] = (xc * scale + beta).astype(o_ref.dtype)


# --------------------------------------------------------------------------- #
# Tile sizing (VMEM-aware)
# --------------------------------------------------------------------------- #
_MAX_ROW_TILE = 1024  # rows; larger gives no measurable roofline gain


def _vmem_capacity_bytes():
    try:
        return int(pltpu.get_tpu_info().vmem_capacity_bytes)
    except Exception:
        return 64 * 1024 * 1024  # conservative (v7x per-TC physical VMEM)


def _row_granularity(dtype):
    # Sublane packing: bf16 packs 16 rows per vreg, 32-bit types pack 8.
    return 16 if jnp.dtype(dtype).itemsize == 2 else 8


def _pick_row_tile(m, h, dtype):
    gran = _row_granularity(dtype)
    itemsize = jnp.dtype(dtype).itemsize
    budget = _vmem_capacity_bytes() // 4            # headroom for pipeline bufs
    bytes_per_row = 2 * 2 * h * itemsize            # (in + out) x double-buffer
    max_rows_vmem = max(gran, (budget // bytes_per_row) // gran * gran)
    m_ceil = -(-m // gran) * gran                   # no point tiling past padded M
    tm = min(_MAX_ROW_TILE, max_rows_vmem, m_ceil)
    return max(gran, (tm // gran) * gran)


# --------------------------------------------------------------------------- #
# pallas_call wrapper
# --------------------------------------------------------------------------- #
@functools.partial(jax.jit, static_argnames=("eps", "tm", "vmem_limit"))
def _bert_layer_norm_2d(x2d, gamma2d, beta2d, *, eps, tm, vmem_limit):
    M, H = x2d.shape  # M is already padded to a multiple of tm
    grid = (M // tm,)
    kernel = functools.partial(bert_layer_norm_kernel, eps=eps, inv_h=1.0 / H)
    return pl.pallas_call(
        kernel,
        out_shape=jax.ShapeDtypeStruct((M, H), x2d.dtype),
        grid_spec=pltpu.PrefetchScalarGridSpec(
            num_scalar_prefetch=0,
            grid=grid,
            in_specs=[
                pl.BlockSpec((tm, H), lambda i: (i, 0)),   # activation rows
                pl.BlockSpec((1, H), lambda i: (0, 0)),    # gamma (constant)
                pl.BlockSpec((1, H), lambda i: (0, 0)),    # beta  (constant)
            ],
            out_specs=pl.BlockSpec((tm, H), lambda i: (i, 0)),
        ),
        compiler_params=pltpu.CompilerParams(
            dimension_semantics=("parallel",),
            vmem_limit_bytes=vmem_limit,
        ),
    )(x2d, gamma2d, beta2d)


def _layer_norm_xla(x, gamma, beta, eps):
    # Tiny-H fallback: with H < 128 the output last dim can't fill a lane,
    # so Pallas stores would be masked vst.msk; plain XLA wins here.
    xf = x.astype(jnp.float32)
    u = jnp.mean(xf, axis=-1, keepdims=True)
    s = jnp.mean((xf - u) ** 2, axis=-1, keepdims=True)
    y = (xf - u) * lax.rsqrt(s + eps)
    return (gamma.astype(jnp.float32) * y + beta.astype(jnp.float32)).astype(x.dtype)


def bert_layer_norm(x, gamma, beta, *, eps=1e-12):
    """x: [..., H]; gamma, beta: [H]. Returns LayerNorm(x) with TF-style eps."""
    orig_shape = x.shape
    H = int(orig_shape[-1])
    M = 1
    for d in orig_shape[:-1]:
        M *= int(d)
    if M == 0:
        return x
    if H < 128:
        return _layer_norm_xla(x, gamma, beta, eps)

    x2d = x.reshape(M, H)
    tm = _pick_row_tile(M, H, x2d.dtype)

    # Ragged M: pad rows to a multiple of tm (zero rows normalize to beta and
    # are discarded below) instead of falling back to one giant block.
    m_pad = -(-M // tm) * tm
    if m_pad != M:
        x2d = jnp.pad(x2d, ((0, m_pad - M), (0, 0)))

    itemsize = jnp.dtype(x2d.dtype).itemsize
    footprint = 2 * 2 * tm * H * itemsize            # double-buffered in + out
    cap = _vmem_capacity_bytes()
    vmem_limit = int(min(cap * 3 // 4, max(32 << 20, footprint * 2)))

    out2d = _bert_layer_norm_2d(
        x2d, gamma.reshape(1, H), beta.reshape(1, H),
        eps=eps, tm=tm, vmem_limit=vmem_limit)

    if m_pad != M:
        out2d = out2d[:M]
    return out2d.reshape(orig_shape)


# --------------------------------------------------------------------------- #
# Reference & tests
# --------------------------------------------------------------------------- #
def reference(x, gamma, beta, eps=1e-12):
    u = jnp.mean(x, axis=-1, keepdims=True)
    s = jnp.mean((x - u) ** 2, axis=-1, keepdims=True)
    y = (x - u) / jnp.sqrt(s + eps)
    return gamma * y + beta


if __name__ == "__main__":
    key = jax.random.PRNGKey(0)

    # --- Small Pallas-path config (hidden=128) ------------------------------
    B, S, H = 2, 8, 128
    kx, kg, kb, key = jax.random.split(key, 4)
    x = jax.random.normal(kx, (B, S, H), dtype=jnp.float32)
    gamma = 1.0 + 0.1 * jax.random.normal(kg, (H,), dtype=jnp.float32)
    beta = 0.02 * jax.random.normal(kb, (H,), dtype=jnp.float32)
    out = jax.block_until_ready(bert_layer_norm(x, gamma, beta))
    ref = reference(x, gamma, beta)
    assert out.shape == (B, S, H)
    assert jnp.allclose(out, ref, atol=1e-5, rtol=1e-5), "mismatch (small)"

    # --- Larger aligned config: multi-step grid, big row tile ---------------
    B2, S2, H2 = 4, 512, 256   # M=2048 -> tm=1024, grid=(2,)
    kx2, kg2, kb2, key = jax.random.split(key, 4)
    x2 = jax.random.normal(kx2, (B2, S2, H2), dtype=jnp.float32)
    gamma2 = 1.0 + 0.1 * jax.random.normal(kg2, (H2,), dtype=jnp.float32)
    beta2 = 0.02 * jax.random.normal(kb2, (H2,), dtype=jnp.float32)
    out2 = jax.block_until_ready(bert_layer_norm(x2, gamma2, beta2))
    ref2 = reference(x2, gamma2, beta2)
    assert jnp.allclose(out2, ref2, atol=1e-5, rtol=1e-5), "mismatch (large)"

    # --- Ragged M + bf16 IO (exercises padding path & 16-row granularity) ---
    B3, S3, H3 = 3, 5, 256     # M=15 -> padded to 16
    kx3, kg3, kb3, key = jax.random.split(key, 4)
    x3 = jax.random.normal(kx3, (B3, S3, H3), dtype=jnp.float32)
    gamma3 = 1.0 + 0.1 * jax.random.normal(kg3, (H3,), dtype=jnp.float32)
    beta3 = 0.02 * jax.random.normal(kb3, (H3,), dtype=jnp.float32)
    out3 = jax.block_until_ready(
        bert_layer_norm(x3.astype(jnp.bfloat16), gamma3, beta3))
    ref3 = reference(x3, gamma3, beta3).astype(jnp.bfloat16)
    assert out3.dtype == jnp.bfloat16 and out3.shape == (B3, S3, H3)
    assert jnp.allclose(out3.astype(jnp.float32), ref3.astype(jnp.float32),
                        atol=3e-2, rtol=3e-2), "mismatch (ragged bf16)"

    # --- Tiny hidden size (H < 128): XLA fallback path -----------------------
    B4, S4, H4 = 2, 8, 32
    kx4, kg4, kb4, key = jax.random.split(key, 4)
    x4 = jax.random.normal(kx4, (B4, S4, H4), dtype=jnp.float32)
    gamma4 = 1.0 + 0.1 * jax.random.normal(kg4, (H4,), dtype=jnp.float32)
    beta4 = 0.02 * jax.random.normal(kb4, (H4,), dtype=jnp.float32)
    out4 = jax.block_until_ready(bert_layer_norm(x4, gamma4, beta4))
    ref4 = reference(x4, gamma4, beta4)
    assert jnp.allclose(out4, ref4, atol=1e-5, rtol=1e-5), "mismatch (tiny H)"

    print("KERNEL_OK")
</pallas_src>

<mosaic_0001>
module attributes {stable_mosaic.version = 11 : i64} {
  func.func @bert_layer_norm_kernel(%arg0: i32, %arg1: memref<16x128xf32, #tpu.memory_space<vmem>>, %arg2: memref<1x128xf32, #tpu.memory_space<vmem>>, %arg3: memref<1x128xf32, #tpu.memory_space<vmem>>, %arg4: memref<16x128xf32, #tpu.memory_space<vmem>>) attributes {dimension_semantics = [#tpu.dimension_semantics<parallel>], iteration_bounds = array<i64: 1>, scalar_prefetch = 0 : i64, scratch_operands = 0 : i64, tpu.core_type = #tpu.core_type<tc>, window_params = [{transform_indices = @transform_0, window_bounds = array<i64: 16, 128>}, {pipeline_mode = #tpu.pipeline_mode<synchronous>, transform_indices = @transform_1, window_bounds = array<i64: 1, 128>}, {pipeline_mode = #tpu.pipeline_mode<synchronous>, transform_indices = @transform_2, window_bounds = array<i64: 1, 128>}, {transform_indices = @transform_3, window_bounds = array<i64: 16, 128>}]} {
    %c0 = arith.constant 0 : index
    %c0_0 = arith.constant 0 : index
    %0 = vector.load %arg1[%c0, %c0_0] : memref<16x128xf32, #tpu.memory_space<vmem>>, vector<16x128xf32>
    %cst = arith.constant dense<0.000000e+00> : vector<16xf32>
    %1 = vector.multi_reduction <add>, %0, %cst [1] : vector<16x128xf32> to vector<16xf32>
    %2 = vector.shape_cast %1 : vector<16xf32> to vector<16x1xf32>
    %cst_1 = arith.constant 7.812500e-03 : f32
    %3 = vector.broadcast %cst_1 : f32 to vector<16x1xf32>
    %4 = arith.mulf %2, %3 : vector<16x1xf32>
    %5 = vector.broadcast %4 : vector<16x1xf32> to vector<16x128xf32>
    %6 = arith.subf %0, %5 : vector<16x128xf32>
    %7 = arith.mulf %6, %6 : vector<16x128xf32>
    %cst_2 = arith.constant dense<0.000000e+00> : vector<16xf32>
    %8 = vector.multi_reduction <add>, %7, %cst_2 [1] : vector<16x128xf32> to vector<16xf32>
    %9 = vector.shape_cast %8 : vector<16xf32> to vector<16x1xf32>
    %cst_3 = arith.constant 7.812500e-03 : f32
    %10 = vector.broadcast %cst_3 : f32 to vector<16x1xf32>
    %11 = arith.mulf %9, %10 : vector<16x1xf32>
    %cst_4 = arith.constant 9.99999996E-13 : f32
    %12 = vector.broadcast %cst_4 : f32 to vector<16x1xf32>
    %13 = arith.addf %11, %12 : vector<16x1xf32>
    %14 = math.rsqrt %13 : vector<16x1xf32>
    %c0_5 = arith.constant 0 : index
    %c0_6 = arith.constant 0 : index
    %15 = vector.load %arg2[%c0_5, %c0_6] : memref<1x128xf32, #tpu.memory_space<vmem>>, vector<1x128xf32>
    %16 = vector.broadcast %15 : vector<1x128xf32> to vector<16x128xf32>
    %17 = vector.broadcast %14 : vector<16x1xf32> to vector<16x128xf32>
    %18 = arith.mulf %16, %17 : vector<16x128xf32>
    %c0_7 = arith.constant 0 : index
    %c0_8 = arith.constant 0 : index
    %19 = vector.load %arg3[%c0_7, %c0_8] : memref<1x128xf32, #tpu.memory_space<vmem>>, vector<1x128xf32>
    %20 = arith.mulf %6, %18 : vector<16x128xf32>
    %21 = vector.broadcast %19 : vector<1x128xf32> to vector<16x128xf32>
    %22 = arith.addf %20, %21 : vector<16x128xf32>
    %c0_9 = arith.constant 0 : index
    %c0_10 = arith.constant 0 : index
    %23 = vector.load %arg4[%c0_9, %c0_10] : memref<16x128xf32, #tpu.memory_space<vmem>>, vector<16x128xf32>
    tpu.vector_store %arg4[%c0_9, %c0_10], %22 {strides = array<i32>} : memref<16x128xf32, #tpu.memory_space<vmem>>, vector<16x128xf32>,
    return
  }
  func.func @transform_0(%arg0: i32) -> (i32, i32) {
    %c0_i32 = arith.constant 0 : i32
    %c0_i32_0 = arith.constant 0 : i32
    return %arg0, %c0_i32 : i32, i32
  }
  func.func @transform_1(%arg0: i32) -> (i32, i32) {
    %c0_i32 = arith.constant 0 : i32
    %c0_i32_0 = arith.constant 0 : i32
    %c0_i32_1 = arith.constant 0 : i32
    return %c0_i32, %c0_i32_0 : i32, i32
  }
  func.func @transform_2(%arg0: i32) -> (i32, i32) {
    %c0_i32 = arith.constant 0 : i32
    %c0_i32_0 = arith.constant 0 : i32
    %c0_i32_1 = arith.constant 0 : i32
    return %c0_i32, %c0_i32_0 : i32, i32
  }
  func.func @transform_3(%arg0: i32) -> (i32, i32) {
    %c0_i32 = arith.constant 0 : i32
    %c0_i32_0 = arith.constant 0 : i32
    return %arg0, %c0_i32 : i32, i32
  }
}

</mosaic_0001>

<bundles_post_ra>
// kernel: _bert_layer_norm_2d.1
= control target key start
LH: loop header
LB: loop body
LE: loop exit
PB: predicated region body
PF: predicated region fallthrough
CT: control target
= control target key end

     0   :  { %8 = vsyncpa [#allocation3], 0  ;;  %s186_s0 = inlined_call_operand.hbm [shape: f32[16,128], index: 0, kind: input, shape index: {}]   ;;  %s187_s1 = inlined_call_operand.vmem [shape: f32[1,128], index: 1, kind: input, shape index: {}]   ;;  %s188_s2 = inlined_call_operand.vmem [shape: f32[1,128], index: 2, kind: input, shape index: {}]   ;;  %s189_s3 = inlined_call_operand.hbm [shape: f32[16,128], index: 3, kind: output, shape index: {}]  }
   0x1   :  { %9 = vsyncpa [#allocation4], 0  ;;  %s144_s12 = smov [#allocation2]  }
   0x2   :  { %s15_s13 = sshll.u32 %s144_s12, 4  ;;  %s16_s13 = int_to_ptr.vmem [resolvable:$true] %s15_s13 }
   0x3   :  { %s108_s14 = scalar_lea.vmem %s16_s13, 256  ;;  %p113_p1 = scmp.lt.s32.totalorder %s16_s13, %s16_s13 }
   0x4   :  { %p109_p0 = scmp.ne.s32.totalorder %s16_s13, %s108_s14  ;;  %p114_p2 = scmp.lt.s32.totalorder %s108_s14, %s108_s14 }
   0x6   :  { %p115_p3 = por %p114_p2, %p113_p1 }
   0x8   :  { %p116_p4 = pnand %p115_p3, %p109_p0 }
   0xa   :  { %119 = shalt.err (!%p116_p4)
}
   0xb   :  { %s145_s15 = smov 128   ;;  %s146_s16 = smov 8  }
   0xc   :  { %21 = dma.hbm_to_vmem [thread:$0]  %s186_s0, 256, %s16_s13, [#allocation3], %s145_s15, %s145_s15, %s146_s16  }
   0xd   :  { %140 = dma.done.wait [#allocation3], 256  }
   0xe   :  { %141 = vsyncadd [#allocation3], 4294967040  ;;  %v29_v0 = vld [vmem:[#allocation2] sm:$0xff]  ;;  %v30_v1 = vld [vmem:[#allocation2 + $0x8] sm:$0xff]  ;;  %s147_s22 = smov [#allocation5]  }
   0xf   :  { %31 = vadd.xlane.f32.xlu0 %v29_v0  ;;  %v90_v16 = vld [vmem:[%s187_s1] ss:$0 sm:$0xff]  ;;  %s78_s23 = sshll.u32 %s147_s22, 4  ;;  %s79_s23 = int_to_ptr.vmem [resolvable:$true] %s78_s23 }
  0x10   :  { %v91_v19 = vld [vmem:[%s188_s2] ss:$0 sm:$0xff]  ;;  %s120_s24 = scalar_lea.vmem %s79_s23, 256  ;;  %p125_p6 = scmp.lt.s32.totalorder %s79_s23, %s79_s23 }
  0x11   :  { %p121_p5 = scmp.ne.s32.totalorder %s79_s23, %s120_s24  ;;  %p126_p7 = scmp.lt.s32.totalorder %s120_s24, %s120_s24 }
  0x13   :  { %33 = vadd.xlane.f32.xlu0 %v30_v1  ;;  %p127_p8 = por %p126_p7, %p125_p6 }
  0x15   :  { %p128_p9 = pnand %p127_p8, %p121_p5 }
  0x98   :  { %v32_v2 = vpop.xlane.xlu0 %31 }
  0x99   :  { %v35_v3 = vmul.f32 0.0078125, %v32_v2 }
  0x9b   :  { %v37_v4 = vsub.f32 %v29_v0, %v35_v3 }
  0x9c   :  { %v34_v5 = vpop.xlane.xlu0 %33 }
  0x9d   :  { %v36_v6 = vmul.f32 0.0078125, %v34_v5  ;;  %v39_v7 = vmul.f32 %v37_v4, %v37_v4 }
  0x9f   :  { %v38_v8 = vsub.f32 %v30_v1, %v36_v6  ;;  %41 = vadd.xlane.f32.xlu1 %v39_v7 }
  0xa1   :  { %v40_v9 = vmul.f32 %v38_v8, %v38_v8 }
  0xa3   :  { %43 = vadd.xlane.f32.xlu1 %v40_v9 }
 0x128   :  { %v42_v10 = vpop.xlane.xlu1 %41 }
 0x129   :  { %v45_v11 = vmul.f32 0.0078125, %v42_v10 }
 0x12b   :  { %v47_v12 = vadd.f32 1e-12, %v45_v11 }
 0x12c   :  { %v44_v13 = vpop.xlane.xlu1 %43 }
 0x12d   :  { %96 = vrsqrt.f32 %v47_v12  ;;  %v46_v14 = vmul.f32 0.0078125, %v44_v13 }
 0x12f   :  { %v48_v15 = vadd.f32 1e-12, %v46_v14 }
 0x131   :  { %98 = vrsqrt.f32 %v48_v15 }
 0x13a   :  { %v97_v17 = vpop.eup %96 }
 0x13b   :  { %v58_v18 = vmul.f32 %v97_v17, %v90_v16 }
 0x13d   :  { %v61_v20 = vmul.f32 %v58_v18, %v37_v4 }
 0x13e   :  { %v99_v21 = vpop.eup %98 }
 0x13f   :  { %v59_v22 = vmul.f32 %v99_v21, %v90_v16  ;;  %v69_v23 = vadd.f32 %v91_v19, %v61_v20 }
 0x141   :  { %v62_v24 = vmul.f32 %v59_v22, %v38_v8  ;;  %71 = vst [vmem:[#allocation5] sm:$0xff] %v69_v23 }
 0x143   :  { %v70_v25 = vadd.f32 %v91_v19, %v62_v24 }
 0x145   :  { %72 = vst [vmem:[#allocation5 + $0x8] sm:$0xff] %v70_v25 }
 0x146   :  { %131 = shalt.err (!%p128_p9)
}
 0x147   :  { %84 = dma.vmem_to_hbm [thread:$0]  %s79_s23, 256, %s189_s3, [#allocation4], %s145_s15, %s145_s15, %s146_s16  }
 0x148   :  { %142 = dma.done.wait [#allocation4], 256  }
 0x149   :  { %143 = vsyncadd [#allocation4], 4294967040 }
 0x14a   :  { %88 = vsyncpa [#allocation3], 1 }
 0x14b   :  { %89 = vsyncpa [#allocation4], 1 }

</bundles_post_ra>
